<compile_context>
chip_gen: v6e
topology: v6e:2x2x1
jax: 0.10.0
libtpu: 0.0.40
codegen_flags: <defaults>
</compile_context>

<pallas_src>
import functools

import numpy as np
import jax
import jax.numpy as jnp
from jax import lax
from jax.experimental import pallas as pl
from jax.experimental.pallas import tpu as pltpu

_EPS = float(np.finfo(np.float32).eps)  # == torch.finfo(torch.float32).eps


def _recip_newton(x):
    """Approx EUP reciprocal + one Newton step (~1e-7 rel err); used where the
    result feeds exp()."""
    r = pl.reciprocal(x, approx=True)
    return r * (2.0 - x * r)


def _quantity_layout(C, bounds, smooth):
    """Ordered accumulator-row layout shared by the kernel and the host finalize."""
    names = ["abs"]
    if bounds:
        names += ["bl1", "bl2"]
        names += [f"m{c}" for c in range(C)]
        names += [f"lu{c}" for c in range(C)]
    if smooth:
        names += ["sd", "sx", "sy"]
    return {n: i for i, n in enumerate(names)}


def _pude_loss_kernel(scal_ref, dP_ref, dD_ref, I_ref, acc_ref, *,
                      gamma, C, GR, qi, bounds, smooth, need_I):
    j = pl.program_id(1)  # tile index within the row-group ("arbitrary" axis)

    @pl.when(j == 0)
    def _init():
        acc_ref[...] = jnp.zeros_like(acc_ref)

    dP = dP_ref[...].astype(jnp.float32)                 # (TR, W)
    dD = dD_ref[...].astype(jnp.float32)                 # (TR, W)
    TR, W = dP.shape
    Is = [I_ref[c].astype(jnp.float32) for c in range(C)] if need_I else None

    def part(x):
        # (TR, W) -> (GR, W) per-sublane partial column sums.  When TR % 8 == 0 the
        # reshape is a layout no-op and the sum is pure full-vreg VPU adds; the
        # 8->1 sublane and lane reductions are deferred to the host finalize.
        if GR == 8:
            return jnp.sum(x.reshape(TR // 8, 8, W), axis=0)
        return jnp.sum(x, axis=0, keepdims=True)

    NQ = len(qi)
    parts = [None] * NQ

    # ---- trimmed similarity numerator: sum |d_P - d_D| ----
    parts[qi["abs"]] = part(jnp.abs(dP - dD))

    # ---- bound losses (lower + upper) ----
    if bounds:
        mu = scal_ref[0]
        inv_D = _recip_newton(dD + mu)                   # feeds exp(): keep Newton
        inv_P = _recip_newton(dP + mu)
        bl1_sum = None
        bl2_sum = None
        for c in range(C):
            nu_c = scal_ref[1 + c]
            B_c = scal_ref[1 + C + c]
            I_c = Is[c]
            t_D = jnp.exp(-nu_c * inv_D)
            t_P = jnp.exp(-nu_c * inv_P)
            tPB = t_P * B_c
            bl1 = B_c - I_c - tPB                        # == -I + (1 - t_P) * B
            bl2 = -t_P - bl1
            r1 = jnp.maximum(bl1, 0.0)
            r2 = jnp.maximum(bl2, 0.0)
            bl1_sum = r1 if bl1_sum is None else bl1_sum + r1
            bl2_sum = r2 if bl2_sum is None else bl2_sum + r2
            # Approx-only reciprocal: the result is thresholded/clipped against gamma.
            expr = (B_c - t_D * B_c) * pl.reciprocal(I_c + _EPS, approx=True)
            M = jnp.clip(expr - gamma, 0.0, 1.0)         # relu then 1 - relu(1 - .)
            parts[qi[f"m{c}"]] = part(M)
            lu = M * (tPB - t_D + I_c) - B_c             # == -(1 - t_P M) B - t_D M + I M
            parts[qi[f"lu{c}"]] = part(jnp.maximum(lu, 0.0))
        parts[qi["bl1"]] = part(bl1_sum)                 # channel-summed locally
        parts[qi["bl2"]] = part(bl2_sum)

    # ---- edge-aware smoothness (statically skipped when betas[2] == 0) ----
    if smooth:
        parts[qi["sd"]] = part(dP)                       # for mean(d), hoisted to host
        # x-direction: lane roll instead of lane-unaligned slices; the iota-derived
        # mask zeroes the single wrap position whichever way the rotate goes.
        lane = lax.broadcasted_iota(jnp.float32, (TR, W), 1)
        lane_r = pltpu.roll(lane, W - 1, axis=1)
        valid_x = (jnp.abs(lane_r - lane) == 1.0).astype(jnp.float32)
        ddx = jnp.abs(pltpu.roll(dP, W - 1, axis=1) - dP)
        wsum_x = None
        for c in range(C):
            w = jnp.exp(-jnp.abs(pltpu.roll(Is[c], W - 1, axis=1) - Is[c]))
            wsum_x = w if wsum_x is None else wsum_x + w
        parts[qi["sx"]] = part(ddx * wsum_x * valid_x)
        # y-direction: adjacent rows inside the tile; tile-seam pairs are patched on
        # the host, so no carried halo scratch is needed.
        if TR > 1:
            ddy = jnp.abs(dP[1:, :] - dP[:-1, :])
            wsum_y = None
            for c in range(C):
                w = jnp.exp(-jnp.abs(Is[c][1:, :] - Is[c][:-1, :]))
                wsum_y = w if wsum_y is None else wsum_y + w
            sy = jnp.sum(ddy * wsum_y, axis=0, keepdims=True)       # (1, W)
            if GR > 1:
                sy = jnp.concatenate(
                    [sy, jnp.zeros((GR - 1, W), jnp.float32)], axis=0)
            parts[qi["sy"]] = sy
        else:
            parts[qi["sy"]] = jnp.zeros((GR, W), jnp.float32)

    # ---- single aligned full-block accumulator update per grid step ----
    staged = jnp.stack(parts, axis=0)                    # (NQ, GR, W)
    acc_ref[...] = acc_ref[...] + staged[None]


def _order_statistic_nonneg_f32(x, rank):
    """Exact `rank`-th smallest (0-indexed) element of a non-negative float32 array
    via 4-pass MSD radix selection on the bit patterns (no O(S log S) sort)."""
    bits = lax.bitcast_convert_type(x.astype(jnp.float32).reshape(-1), jnp.uint32)
    prefix = jnp.uint32(0)
    r = jnp.int32(rank)
    for shift in (24, 16, 8, 0):
        digit = (bits >> jnp.uint32(shift)) & jnp.uint32(0xFF)
        if shift == 24:
            in_set = jnp.ones(bits.shape, dtype=jnp.bool_)
        else:
            hi = jnp.uint32(shift + 8)
            in_set = (bits >> hi) == (prefix >> hi)
        sel = jnp.where(in_set, digit, jnp.uint32(256)).astype(jnp.int32)
        hist = jnp.bincount(sel, length=257)[:256]
        cum = jnp.cumsum(hist)
        d = jnp.argmax(cum > r).astype(jnp.int32)        # first digit with cum > r
        below = jnp.where(d > 0, cum[jnp.maximum(d - 1, 0)], 0)
        r = r - below.astype(jnp.int32)
        prefix = prefix | (d.astype(jnp.uint32) << jnp.uint32(shift))
    return lax.bitcast_convert_type(prefix, jnp.float32)


def _vmem_capacity_bytes():
    try:
        cap = getattr(pltpu.get_tpu_info(), "vmem_capacity_bytes", None)
        if cap:
            return int(cap)
    except Exception:
        pass
    return 64 * 1024 * 1024          # conservative fallback (v7x-sized VMEM)


def _pick_tiling(H, W, C, need_I, vmem_cap, tile_rows=None, row_groups=None):
    """Pick (row_groups, tile_rows): prefer 2 row-groups (v7x dual-TC), largest
    multiple-of-8 tile within a generation-aware VMEM budget that also covers the
    in-kernel f32 temporaries."""
    budget = min(24 << 20, max(4 << 20, vmem_cap // 5))
    per_row = (2 * (2 + (C if need_I else 0)) + 14) * W * 4
    max_rows = max(8, min(512, budget // max(per_row, 1)))

    ncs = [int(row_groups)] if row_groups is not None else [2, 1]
    for nc in ncs:
        if nc < 1 or H % nc != 0:
            continue
        Hg = H // nc
        if tile_rows is not None:
            tr = int(tile_rows)
            if Hg % tr == 0 and (tr % 8 == 0 or (nc == 1 and tr == H)):
                return nc, tr
            continue
        if Hg % 8 == 0:
            best = 8
            for tr in range(8, Hg + 1, 8):
                if Hg % tr == 0 and tr <= max_rows:
                    best = tr
            return nc, best
        if nc == 1:
            return 1, H
    return 1, H


def pude_loss(d_P, d_D, I, t_hat_nu, t_hat_mu, B_infty, *, H, W,
              alphas=(1, 1, 2), betas=(5, 100, 0, 1),
              trimming_rate=0.3, gamma=0.6, tile_rows=None, row_groups=None):
    S = int(d_P.shape[0])
    C = int(I.shape[0])
    assert S == H * W, "d_P / d_D are the flattened (H, W) depth maps"
    alphas = tuple(float(a) for a in alphas)
    betas = tuple(float(b) for b in betas)
    bounds = betas[1] != 0.0
    smooth = betas[2] != 0.0
    if smooth:
        assert C == 2, "edge-aware smoothness views I as (2, H, W)"
    need_I = bounds or smooth

    dP32 = d_P.astype(jnp.float32)
    dD32 = d_D.astype(jnp.float32)

    # Trimmed median of |d_P - d_D|: exact order statistic via 4-pass radix select
    # (replaces the full host-side sort).
    # TODO(synk): fuse the abs-diff histogram into the main kernel to avoid the
    # extra HBM pass over d_P / d_D at production image sizes.
    abs_diff = jnp.abs(dP32 - dD32).reshape(-1)
    num_pixels = int((1.0 - trimming_rate) * S)
    rank = S - num_pixels + (num_pixels - 1) // 2        # lower median of top slice
    median = _order_statistic_nonneg_f32(abs_diff, rank)

    scalars = jnp.concatenate([
        jnp.reshape(t_hat_mu, (-1,))[:1].astype(jnp.float32),
        jnp.reshape(t_hat_nu, (-1,)).astype(jnp.float32),
        jnp.reshape(B_infty, (-1,)).astype(jnp.float32),
    ])                                                   # (1 + 2C,) SMEM scalars

    # deduplicated spatial views; native dtype is DMA'd, cast to f32 in-kernel
    dP2 = d_P.reshape(H, W)
    dD2 = d_D.reshape(H, W)
    I3 = I.reshape(C, H, W)

    vmem_cap = _vmem_capacity_bytes()
    NC, TR = _pick_tiling(H, W, C, need_I, vmem_cap, tile_rows, row_groups)
    Hg = H // NC
    steps = Hg // TR
    GR = 8 if TR % 8 == 0 else 1

    qi = _quantity_layout(C, bounds, smooth)
    NQ = len(qi)

    # VMEM budget: double-buffered input tiles + resident accumulator block + the
    # live f32 temporaries of the body, clamped to <= 3/4 of physical VMEM.
    in_bytes = 2 * 2 * TR * W * dP2.dtype.itemsize
    if need_I:
        in_bytes += 2 * C * TR * W * I3.dtype.itemsize
        i_spec = pl.BlockSpec((C, TR, W), lambda p, j: (0, p * steps + j, 0))
    else:
        i_spec = pl.BlockSpec(memory_space=pl.ANY)       # never DMA'd, never read
    acc_bytes = 2 * NQ * GR * W * 4
    tmp_bytes = 14 * TR * W * 4
    vmem_limit = int(max(8 << 20,
                         min(in_bytes + acc_bytes + tmp_bytes + (2 << 20),
                             (vmem_cap * 3) // 4)))

    kernel = functools.partial(
        _pude_loss_kernel, gamma=float(gamma), C=C, GR=GR, qi=qi,
        bounds=bounds, smooth=smooth, need_I=need_I)

    acc = pl.pallas_call(
        kernel,
        out_shape=jax.ShapeDtypeStruct((NC, NQ, GR, W), jnp.float32),
        grid=(NC, steps),
        in_specs=[
            pl.BlockSpec(memory_space=pltpu.MemorySpace.SMEM),      # scalars
            pl.BlockSpec((TR, W), lambda p, j: (p * steps + j, 0)),  # d_P
            pl.BlockSpec((TR, W), lambda p, j: (p * steps + j, 0)),  # d_D
            i_spec,                                                   # I
        ],
        out_specs=pl.BlockSpec((1, NQ, GR, W), lambda p, j: (p, 0, 0, 0)),
        compiler_params=pltpu.CompilerParams(
            dimension_semantics=("parallel", "arbitrary"),
            vmem_limit_bytes=vmem_limit),
    )(scalars, dP2, dD2, I3)

    # ---- host finalize (tiny): combine row-group partials, apply the divides ----
    tot = jnp.sum(acc, axis=(0, 2, 3))                   # (NQ,) per-quantity totals
    inv_S = 1.0 / float(S)
    loss = betas[0] * (tot[qi["abs"]] / (_EPS + median) * inv_S)
    if bounds:
        l_bl1 = tot[qi["bl1"]] * inv_S
        l_bl2 = tot[qi["bl2"]] * inv_S
        l_lu = 0.0
        for c in range(C):
            # _EPS guards a 0/0 if a channel's mask M is empty (negligible otherwise).
            l_lu = l_lu + tot[qi[f"lu{c}"]] / (tot[qi[f"m{c}"]] + _EPS)
        loss = loss + betas[1] * (alphas[0] * l_bl1 + alphas[1] * l_bl2
                                  + alphas[2] * l_lu)
    if smooth:
        mean_d = tot[qi["sd"]] * inv_S
        sx = tot[qi["sx"]] / float(C * H * (W - 1))
        sy_sum = tot[qi["sy"]]
        if H // TR > 1:
            rs = np.arange(TR, H, TR)                    # the few tile-seam rows
            dpa = dP2[rs - 1, :].astype(jnp.float32)
            dpb = dP2[rs, :].astype(jnp.float32)
            w = jnp.sum(jnp.exp(-jnp.abs(I3[:, rs, :].astype(jnp.float32)
                                         - I3[:, rs - 1, :].astype(jnp.float32))),
                        axis=0)
            sy_sum = sy_sum + jnp.sum(jnp.abs(dpb - dpa) * w)
        sy = sy_sum / float(C * (H - 1) * W)
        loss = loss + betas[2] * ((sx + sy) / jnp.abs(mean_d))
    # d_old is None -> ground_truth_loss == 0 -> the betas[3] term contributes 0.
    return loss


def pude_loss_reference(d_P, d_D, I, t_hat_nu, t_hat_mu, B_infty, *, H, W,
                        alphas=(1, 1, 2), betas=(5, 100, 0, 1),
                        trimming_rate=0.3, gamma=0.6):
    """Direct pure-JAX transcription of the torch forward (d_old=None path)."""
    alphas = tuple(float(a) for a in alphas)
    betas = tuple(float(b) for b in betas)
    d_P = d_P.astype(jnp.float32)
    d_D = d_D.astype(jnp.float32)
    I = I.astype(jnp.float32)
    nu = jnp.reshape(t_hat_nu, (-1,)).astype(jnp.float32)
    B = jnp.reshape(B_infty, (-1,)).astype(jnp.float32)
    mu = jnp.reshape(t_hat_mu, (-1,))[0].astype(jnp.float32)
    S = d_P.shape[0]

    abs_diff = jnp.abs(d_P - d_D)
    num_pixels = int((1.0 - trimming_rate) * S)
    rank = S - num_pixels + (num_pixels - 1) // 2
    median = jnp.sort(abs_diff)[rank]
    sim = jnp.mean(abs_diff / (_EPS + median))

    d2 = d_P.reshape(1, H, W)
    I3 = I.reshape(2, H, W)
    mean_d = jnp.mean(d2)
    d_star = d2 / mean_d
    ds_dx = d_star[:, :, 1:] - d_star[:, :, :-1]
    ds_dy = d_star[:, 1:, :] - d_star[:, :-1, :]
    I_dx = I3[:, :, 1:] - I3[:, :, :-1]
    I_dy = I3[:, 1:, :] - I3[:, :-1, :]
    smooth = (jnp.mean(jnp.abs(ds_dx) * jnp.exp(-jnp.abs(I_dx))) +
              jnp.mean(jnp.abs(ds_dy) * jnp.exp(-jnp.abs(I_dy))))

    loss = betas[0] * sim
    if betas[1] != 0:
        Bc = B[:, None]
        t_D = jnp.exp(-nu[:, None] / (d_D[None, :] + mu))
        t_P = jnp.exp(-nu[:, None] / (d_P[None, :] + mu))
        bl1 = -I + (1.0 - t_P) * Bc
        bl2 = -t_P - bl1
        l_bl1 = jnp.sum(jnp.maximum(bl1, 0.0)) / S
        l_bl2 = jnp.sum(jnp.maximum(bl2, 0.0)) / S
        expr = Bc * (1.0 - t_D) / (I + _EPS)
        M = jnp.clip(jnp.maximum(expr - gamma, 0.0), 0.0, 1.0)
        M_nums = jnp.sum(M, axis=1)
        lu = -(1.0 - t_P * M) * Bc - t_D * M + I * M
        l_lu = jnp.sum(jnp.sum(jnp.maximum(lu, 0.0), axis=1) / M_nums)
        bound = alphas[0] * l_bl1 + alphas[1] * l_bl2 + alphas[2] * l_lu
        loss = loss + betas[1] * bound
    loss = loss + betas[2] * smooth
    return loss


if __name__ == "__main__":
    key = jax.random.PRNGKey(0)
    H, W, C = 32, 128, 2          # lane-dense W; smoothness views I as (2, H, W)
    S = H * W

    k1, k2, k3, k4, k5, k6 = jax.random.split(key, 6)
    d_P = jax.random.uniform(k1, (S,), jnp.float32, 0.5, 5.0)        # PUDE depths
    d_D = jax.random.uniform(k2, (S,), jnp.float32, 0.5, 5.0)        # DPT depths
    I = jax.random.uniform(k3, (C, S), jnp.float32, 0.05, 1.0)       # image (channels, HW)
    t_hat_nu = jax.random.uniform(k4, (C,), jnp.float32, 0.5, 2.0)   # per-channel nu
    t_hat_mu = jax.random.uniform(k5, (1,), jnp.float32, 0.1, 0.5)   # mu (scalar use)
    B_infty = jax.random.uniform(k6, (C,), jnp.float32, 0.3, 1.0)    # background light

    # Tolerance: 5e-3 covers the approx (no-Newton) reciprocal feeding the clipped
    # M mask; everything else matches the f32 reference to ~1e-6.
    ref = pude_loss_reference(d_P, d_D, I, t_hat_nu, t_hat_mu, B_infty, H=H, W=W)

    # 1) default betas (5, 100, 0, 1): smoothness statically skipped; small explicit
    #    tiles exercise the 2-row-group parallel axis + multi-step accumulation.
    loss = pude_loss(d_P, d_D, I, t_hat_nu, t_hat_mu, B_infty, H=H, W=W,
                     tile_rows=8, row_groups=2)
    jax.block_until_ready(loss)
    assert jnp.allclose(loss, ref, rtol=5e-3, atol=1e-3), (float(loss), float(ref))

    # 2) smoothness enabled: exercises the roll-based x-gradients, within-tile
    #    y-gradients and the host-side tile-seam patch.
    betas2 = (5, 100, 1, 1)
    loss2 = pude_loss(d_P, d_D, I, t_hat_nu, t_hat_mu, B_infty, H=H, W=W,
                      betas=betas2, tile_rows=8, row_groups=2)
    jax.block_until_ready(loss2)
    ref2 = pude_loss_reference(d_P, d_D, I, t_hat_nu, t_hat_mu, B_infty, H=H, W=W,
                               betas=betas2)
    assert jnp.allclose(loss2, ref2, rtol=5e-3, atol=1e-3), (float(loss2), float(ref2))

    # 3) auto tiling (VMEM-capacity-aware picker + dual row-group default).
    loss3 = pude_loss(d_P, d_D, I, t_hat_nu, t_hat_mu, B_infty, H=H, W=W)
    jax.block_until_ready(loss3)
    assert jnp.allclose(loss3, ref, rtol=5e-3, atol=1e-3), (float(loss3), float(ref))

    print("KERNEL_OK")
</pallas_src>

<mosaic_0001>
module attributes {stable_mosaic.version = 11 : i64} {
  func.func @_pude_loss_kernel(%arg0: i32, %arg1: i32, %arg2: memref<5xf32, #tpu.memory_space<smem>>, %arg3: memref<8x128xf32, #tpu.memory_space<vmem>>, %arg4: memref<8x128xf32, #tpu.memory_space<vmem>>, %arg5: memref<2x8x128xf32, #tpu.memory_space<vmem>>, %arg6: memref<1x7x8x128xf32, #tpu.memory_space<vmem>>) attributes {dimension_semantics = [#tpu.dimension_semantics<parallel>, #tpu.dimension_semantics<arbitrary>], iteration_bounds = array<i64: 2, 2>, scalar_prefetch = 0 : i64, scratch_operands = 0 : i64, tpu.core_type = #tpu.core_type<tc>, window_params = [{transform_indices = @transform_0, window_bounds = array<i64: 5>}, {transform_indices = @transform_1, window_bounds = array<i64: 8, 128>}, {transform_indices = @transform_2, window_bounds = array<i64: 8, 128>}, {transform_indices = @transform_3, window_bounds = array<i64: 2, 8, 128>}, {transform_indices = @transform_4, window_bounds = array<i64: 1, 7, 8, 128>}]} {
    %c0_i32 = arith.constant 0 : i32
    %0 = arith.cmpi eq, %arg1, %c0_i32 : i32
    %1 = arith.extui %0 : i1 to i32
    %c0_i32_0 = arith.constant 0 : i32
    %2 = arith.cmpi ne, %1, %c0_i32_0 : i32
    scf.if %2 {
      %cst_47 = arith.constant 0.000000e+00 : f32
      %140 = vector.broadcast %cst_47 : f32 to vector<1x7x8x128xf32>
      %c0_48 = arith.constant 0 : index
      %c0_49 = arith.constant 0 : index
      %c0_50 = arith.constant 0 : index
      %c0_51 = arith.constant 0 : index
      %141 = vector.load %arg6[%c0_48, %c0_49, %c0_50, %c0_51] : memref<1x7x8x128xf32, #tpu.memory_space<vmem>>, vector<1x7x8x128xf32>
      tpu.vector_store %arg6[%c0_48, %c0_49, %c0_50, %c0_51], %140 {strides = array<i32>} : memref<1x7x8x128xf32, #tpu.memory_space<vmem>>, vector<1x7x8x128xf32>,
    } else {
    }
    %c0 = arith.constant 0 : index
    %c0_1 = arith.constant 0 : index
    %3 = vector.load %arg3[%c0, %c0_1] : memref<8x128xf32, #tpu.memory_space<vmem>>, vector<8x128xf32>
    %c0_2 = arith.constant 0 : index
    %c0_3 = arith.constant 0 : index
    %4 = vector.load %arg4[%c0_2, %c0_3] : memref<8x128xf32, #tpu.memory_space<vmem>>, vector<8x128xf32>
    %c0_4 = arith.constant 0 : index
    %c0_5 = arith.constant 0 : index
    %c0_6 = arith.constant 0 : index
    %5 = vector.load %arg5[%c0_4, %c0_5, %c0_6] : memref<2x8x128xf32, #tpu.memory_space<vmem>>, vector<1x8x128xf32>
    %6 = vector.shape_cast %5 : vector<1x8x128xf32> to vector<8x128xf32>
    %c1 = arith.constant 1 : index
    %c0_7 = arith.constant 0 : index
    %c0_8 = arith.constant 0 : index
    %7 = vector.load %arg5[%c1, %c0_7, %c0_8] : memref<2x8x128xf32, #tpu.memory_space<vmem>>, vector<1x8x128xf32>
    %8 = vector.shape_cast %7 : vector<1x8x128xf32> to vector<8x128xf32>
    %9 = arith.subf %3, %4 : vector<8x128xf32>
    %10 = math.absf %9 : vector<8x128xf32>
    %11 = vector.shape_cast %10 : vector<8x128xf32> to vector<1x8x128xf32>
    %cst = arith.constant dense<0.000000e+00> : vector<8x128xf32>
    %12 = vector.multi_reduction <add>, %11, %cst [0] : vector<1x8x128xf32> to vector<8x128xf32>
    %c0_9 = arith.constant 0 : index
    %13 = memref.load %arg2[%c0_9] : memref<5xf32, #tpu.memory_space<smem>>
    %14 = vector.broadcast %13 : f32 to vector<8x128xf32>
    %15 = arith.addf %4, %14 : vector<8x128xf32>
    %16 = tpu.reciprocal %15 {approx = true} : vector<8x128xf32> -> vector<8x128xf32>
    %17 = arith.mulf %15, %16 : vector<8x128xf32>
    %cst_10 = arith.constant 2.000000e+00 : f32
    %18 = vector.broadcast %cst_10 : f32 to vector<8x128xf32>
    %19 = arith.subf %18, %17 : vector<8x128xf32>
    %20 = arith.mulf %16, %19 : vector<8x128xf32>
    %21 = vector.broadcast %13 : f32 to vector<8x128xf32>
    %22 = arith.addf %3, %21 : vector<8x128xf32>
    %23 = tpu.reciprocal %22 {approx = true} : vector<8x128xf32> -> vector<8x128xf32>
    %24 = arith.mulf %22, %23 : vector<8x128xf32>
    %cst_11 = arith.constant 2.000000e+00 : f32
    %25 = vector.broadcast %cst_11 : f32 to vector<8x128xf32>
    %26 = arith.subf %25, %24 : vector<8x128xf32>
    %27 = arith.mulf %23, %26 : vector<8x128xf32>
    %c1_12 = arith.constant 1 : index
    %28 = memref.load %arg2[%c1_12] : memref<5xf32, #tpu.memory_space<smem>>
    %c3 = arith.constant 3 : index
    %29 = memref.load %arg2[%c3] : memref<5xf32, #tpu.memory_space<smem>>
    %cst_13 = arith.constant 0.000000e+00 : f32
    %30 = arith.subf %cst_13, %28 : f32
    %31 = vector.broadcast %30 : f32 to vector<8x128xf32>
    %32 = arith.mulf %31, %20 : vector<8x128xf32>
    %33 = math.exp %32 : vector<8x128xf32>
    %cst_14 = arith.constant 0.000000e+00 : f32
    %34 = arith.subf %cst_14, %28 : f32
    %35 = vector.broadcast %34 : f32 to vector<8x128xf32>
    %36 = arith.mulf %35, %27 : vector<8x128xf32>
    %37 = math.exp %36 : vector<8x128xf32>
    %38 = vector.broadcast %29 : f32 to vector<8x128xf32>
    %39 = arith.mulf %37, %38 : vector<8x128xf32>
    %40 = vector.broadcast %29 : f32 to vector<8x128xf32>
    %41 = arith.subf %40, %6 : vector<8x128xf32>
    %42 = arith.subf %41, %39 : vector<8x128xf32>
    %cst_15 = arith.constant 0.000000e+00 : f32
    %43 = vector.broadcast %cst_15 : f32 to vector<8x128xf32>
    %44 = arith.subf %43, %37 : vector<8x128xf32>
    %45 = arith.subf %44, %42 : vector<8x128xf32>
    %cst_16 = arith.constant 0.000000e+00 : f32
    %46 = vector.broadcast %cst_16 : f32 to vector<8x128xf32>
    %47 = arith.maximumf %42, %46 : vector<8x128xf32>
    %cst_17 = arith.constant 0.000000e+00 : f32
    %48 = vector.broadcast %cst_17 : f32 to vector<8x128xf32>
    %49 = arith.maximumf %45, %48 : vector<8x128xf32>
    %50 = vector.broadcast %29 : f32 to vector<8x128xf32>
    %51 = arith.mulf %33, %50 : vector<8x128xf32>
    %52 = vector.broadcast %29 : f32 to vector<8x128xf32>
    %53 = arith.subf %52, %51 : vector<8x128xf32>
    %cst_18 = arith.constant 1.1920929E-7 : f32
    %54 = vector.broadcast %cst_18 : f32 to vector<8x128xf32>
    %55 = arith.addf %6, %54 : vector<8x128xf32>
    %56 = tpu.reciprocal %55 {approx = true} : vector<8x128xf32> -> vector<8x128xf32>
    %57 = arith.mulf %53, %56 : vector<8x128xf32>
    %cst_19 = arith.constant 6.000000e-01 : f32
    %58 = vector.broadcast %cst_19 : f32 to vector<8x128xf32>
    %59 = arith.subf %57, %58 : vector<8x128xf32>
    %cst_20 = arith.constant 0.000000e+00 : f32
    %cst_21 = arith.constant 1.000000e+00 : f32
    %60 = vector.broadcast %cst_20 : f32 to vector<8x128xf32>
    %61 = arith.maximumf %60, %59 : vector<8x128xf32>
    %62 = vector.broadcast %cst_21 : f32 to vector<8x128xf32>
    %63 = arith.minimumf %62, %61 : vector<8x128xf32>
    %64 = vector.shape_cast %63 : vector<8x128xf32> to vector<1x8x128xf32>
    %cst_22 = arith.constant dense<0.000000e+00> : vector<8x128xf32>
    %65 = vector.multi_reduction <add>, %64, %cst_22 [0] : vector<1x8x128xf32> to vector<8x128xf32>
    %66 = arith.subf %39, %33 : vector<8x128xf32>
    %67 = arith.addf %66, %6 : vector<8x128xf32>
    %68 = arith.mulf %63, %67 : vector<8x128xf32>
    %69 = vector.broadcast %29 : f32 to vector<8x128xf32>
    %70 = arith.subf %68, %69 : vector<8x128xf32>
    %cst_23 = arith.constant 0.000000e+00 : f32
    %71 = vector.broadcast %cst_23 : f32 to vector<8x128xf32>
    %72 = arith.maximumf %70, %71 : vector<8x128xf32>
    %73 = vector.shape_cast %72 : vector<8x128xf32> to vector<1x8x128xf32>
    %cst_24 = arith.constant dense<0.000000e+00> : vector<8x128xf32>
    %74 = vector.multi_reduction <add>, %73, %cst_24 [0] : vector<1x8x128xf32> to vector<8x128xf32>
    %c2 = arith.constant 2 : index
    %75 = memref.load %arg2[%c2] : memref<5xf32, #tpu.memory_space<smem>>
    %c4 = arith.constant 4 : index
    %76 = memref.load %arg2[%c4] : memref<5xf32, #tpu.memory_space<smem>>
    %cst_25 = arith.constant 0.000000e+00 : f32
    %77 = arith.subf %cst_25, %75 : f32
    %78 = vector.broadcast %77 : f32 to vector<8x128xf32>
    %79 = arith.mulf %78, %20 : vector<8x128xf32>
    %80 = math.exp %79 : vector<8x128xf32>
    %cst_26 = arith.constant 0.000000e+00 : f32
    %81 = arith.subf %cst_26, %75 : f32
    %82 = vector.broadcast %81 : f32 to vector<8x128xf32>
    %83 = arith.mulf %82, %27 : vector<8x128xf32>
    %84 = math.exp %83 : vector<8x128xf32>
    %85 = vector.broadcast %76 : f32 to vector<8x128xf32>
    %86 = arith.mulf %84, %85 : vector<8x128xf32>
    %87 = vector.broadcast %76 : f32 to vector<8x128xf32>
    %88 = arith.subf %87, %8 : vector<8x128xf32>
    %89 = arith.subf %88, %86 : vector<8x128xf32>
    %cst_27 = arith.constant 0.000000e+00 : f32
    %90 = vector.broadcast %cst_27 : f32 to vector<8x128xf32>
    %91 = arith.subf %90, %84 : vector<8x128xf32>
    %92 = arith.subf %91, %89 : vector<8x128xf32>
    %cst_28 = arith.constant 0.000000e+00 : f32
    %93 = vector.broadcast %cst_28 : f32 to vector<8x128xf32>
    %94 = arith.maximumf %89, %93 : vector<8x128xf32>
    %cst_29 = arith.constant 0.000000e+00 : f32
    %95 = vector.broadcast %cst_29 : f32 to vector<8x128xf32>
    %96 = arith.maximumf %92, %95 : vector<8x128xf32>
    %97 = arith.addf %47, %94 : vector<8x128xf32>
    %98 = arith.addf %49, %96 : vector<8x128xf32>
    %99 = vector.broadcast %76 : f32 to vector<8x128xf32>
    %100 = arith.mulf %80, %99 : vector<8x128xf32>
    %101 = vector.broadcast %76 : f32 to vector<8x128xf32>
    %102 = arith.subf %101, %100 : vector<8x128xf32>
    %cst_30 = arith.constant 1.1920929E-7 : f32
    %103 = vector.broadcast %cst_30 : f32 to vector<8x128xf32>
    %104 = arith.addf %8, %103 : vector<8x128xf32>
    %105 = tpu.reciprocal %104 {approx = true} : vector<8x128xf32> -> vector<8x128xf32>
    %106 = arith.mulf %102, %105 : vector<8x128xf32>
    %cst_31 = arith.constant 6.000000e-01 : f32
    %107 = vector.broadcast %cst_31 : f32 to vector<8x128xf32>
    %108 = arith.subf %106, %107 : vector<8x128xf32>
    %cst_32 = arith.constant 0.000000e+00 : f32
    %cst_33 = arith.constant 1.000000e+00 : f32
    %109 = vector.broadcast %cst_32 : f32 to vector<8x128xf32>
    %110 = arith.maximumf %109, %108 : vector<8x128xf32>
    %111 = vector.broadcast %cst_33 : f32 to vector<8x128xf32>
    %112 = arith.minimumf %111, %110 : vector<8x128xf32>
    %113 = vector.shape_cast %112 : vector<8x128xf32> to vector<1x8x128xf32>
    %cst_34 = arith.constant dense<0.000000e+00> : vector<8x128xf32>
    %114 = vector.multi_reduction <add>, %113, %cst_34 [0] : vector<1x8x128xf32> to vector<8x128xf32>
    %115 = arith.subf %86, %80 : vector<8x128xf32>
    %116 = arith.addf %115, %8 : vector<8x128xf32>
    %117 = arith.mulf %112, %116 : vector<8x128xf32>
    %118 = vector.broadcast %76 : f32 to vector<8x128xf32>
    %119 = arith.subf %117, %118 : vector<8x128xf32>
    %cst_35 = arith.constant 0.000000e+00 : f32
    %120 = vector.broadcast %cst_35 : f32 to vector<8x128xf32>
    %121 = arith.maximumf %119, %120 : vector<8x128xf32>
    %122 = vector.shape_cast %121 : vector<8x128xf32> to vector<1x8x128xf32>
    %cst_36 = arith.constant dense<0.000000e+00> : vector<8x128xf32>
    %123 = vector.multi_reduction <add>, %122, %cst_36 [0] : vector<1x8x128xf32> to vector<8x128xf32>
    %124 = vector.shape_cast %97 : vector<8x128xf32> to vector<1x8x128xf32>
    %cst_37 = arith.constant dense<0.000000e+00> : vector<8x128xf32>
    %125 = vector.multi_reduction <add>, %124, %cst_37 [0] : vector<1x8x128xf32> to vector<8x128xf32>
    %126 = vector.shape_cast %98 : vector<8x128xf32> to vector<1x8x128xf32>
    %cst_38 = arith.constant dense<0.000000e+00> : vector<8x128xf32>
    %127 = vector.multi_reduction <add>, %126, %cst_38 [0] : vector<1x8x128xf32> to vector<8x128xf32>
    %128 = vector.shape_cast %12 : vector<8x128xf32> to vector<1x8x128xf32>
    %129 = vector.shape_cast %125 : vector<8x128xf32> to vector<1x8x128xf32>
    %130 = vector.shape_cast %127 : vector<8x128xf32> to vector<1x8x128xf32>
    %131 = vector.shape_cast %65 : vector<8x128xf32> to vector<1x8x128xf32>
    %132 = vector.shape_cast %114 : vector<8x128xf32> to vector<1x8x128xf32>
    %133 = vector.shape_cast %74 : vector<8x128xf32> to vector<1x8x128xf32>
    %134 = vector.shape_cast %123 : vector<8x128xf32> to vector<1x8x128xf32>
    %135 = tpu.concatenate %128, %129, %130, %131, %132, %133, %134 in 0 : vector<1x8x128xf32>, vector<1x8x128xf32>, vector<1x8x128xf32>, vector<1x8x128xf32>, vector<1x8x128xf32>, vector<1x8x128xf32>, vector<1x8x128xf32> -> vector<7x8x128xf32>
    %c0_39 = arith.constant 0 : index
    %c0_40 = arith.constant 0 : index
    %c0_41 = arith.constant 0 : index
    %c0_42 = arith.constant 0 : index
    %136 = vector.load %arg6[%c0_39, %c0_40, %c0_41, %c0_42] : memref<1x7x8x128xf32, #tpu.memory_space<vmem>>, vector<1x7x8x128xf32>
    %137 = vector.shape_cast %135 : vector<7x8x128xf32> to vector<1x7x8x128xf32>
    %138 = arith.addf %136, %137 : vector<1x7x8x128xf32>
    %c0_43 = arith.constant 0 : index
    %c0_44 = arith.constant 0 : index
    %c0_45 = arith.constant 0 : index
    %c0_46 = arith.constant 0 : index
    %139 = vector.load %arg6[%c0_43, %c0_44, %c0_45, %c0_46] : memref<1x7x8x128xf32, #tpu.memory_space<vmem>>, vector<1x7x8x128xf32>
    tpu.vector_store %arg6[%c0_43, %c0_44, %c0_45, %c0_46], %138 {strides = array<i32>} : memref<1x7x8x128xf32, #tpu.memory_space<vmem>>, vector<1x7x8x128xf32>,
    return
  }
  func.func @transform_0(%arg0: i32, %arg1: i32) -> i32 {
    %c0_i32 = arith.constant 0 : i32
    %c0_i32_0 = arith.constant 0 : i32
    return %c0_i32 : i32
  }
  func.func @transform_1(%arg0: i32, %arg1: i32) -> (i32, i32) {
    %c2_i32 = arith.constant 2 : i32
    %0 = arith.muli %arg0, %c2_i32 : i32
    %1 = arith.addi %0, %arg1 : i32
    %c0_i32 = arith.constant 0 : i32
    %c0_i32_0 = arith.constant 0 : i32
    return %1, %c0_i32 : i32, i32
  }
  func.func @transform_2(%arg0: i32, %arg1: i32) -> (i32, i32) {
    %c2_i32 = arith.constant 2 : i32
    %0 = arith.muli %arg0, %c2_i32 : i32
    %1 = arith.addi %0, %arg1 : i32
    %c0_i32 = arith.constant 0 : i32
    %c0_i32_0 = arith.constant 0 : i32
    return %1, %c0_i32 : i32, i32
  }
  func.func @transform_3(%arg0: i32, %arg1: i32) -> (i32, i32, i32) {
    %c2_i32 = arith.constant 2 : i32
    %0 = arith.muli %arg0, %c2_i32 : i32
    %1 = arith.addi %0, %arg1 : i32
    %c0_i32 = arith.constant 0 : i32
    %c0_i32_0 = arith.constant 0 : i32
    %c0_i32_1 = arith.constant 0 : i32
    return %c0_i32, %1, %c0_i32_0 : i32, i32, i32
  }
  func.func @transform_4(%arg0: i32, %arg1: i32) -> (i32, i32, i32, i32) {
    %c0_i32 = arith.constant 0 : i32
    %c0_i32_0 = arith.constant 0 : i32
    %c0_i32_1 = arith.constant 0 : i32
    %c0_i32_2 = arith.constant 0 : i32
    return %arg0, %c0_i32, %c0_i32_0, %c0_i32_1 : i32, i32, i32, i32
  }
}

</mosaic_0001>

<bundles_post_ra>
// kernel: tpu_custom_call.1
= control target key start
LH: loop header
LB: loop body
LE: loop exit
PB: predicated region body
PF: predicated region fallthrough
CT: control target
= control target key end

     0   :  { %s1369_s0 = inlined_call_operand.hbm [shape: f32[5], index: 0, kind: input, shape index: {}]   ;;  %s1370_s1 = inlined_call_operand.hbm [shape: f32[32,128], index: 1, kind: input, shape index: {}]   ;;  %s1371_s2 = inlined_call_operand.hbm [shape: f32[32,128], index: 2, kind: input, shape index: {}]   ;;  %s1372_s3 = inlined_call_operand.hbm [shape: f32[2,32,128], index: 3, kind: input, shape index: {}]   ;;  %s1373_s4 = inlined_call_operand.hbm [shape: f32[2,7,8,128], index: 4, kind: output, shape index: {}]  }
   0x1   :  { %1380 = sst [smem:[#allocation20_spill]] %s1370_s1 }
   0x2   :  { %1381 = sst [smem:[#allocation21_spill]] %s1371_s2 }
   0x3   :  { %1382 = sst [smem:[#allocation22_spill]] %s1373_s4 }
   0x4   :  { %9 = vsyncpa [#allocation5], 0 }
   0x5   :  { %10 = vsyncpa [#allocation3], 0 }
   0x6   :  { %12 = vsyncpa [#allocation3 + $0x1], 0 }
   0x7   :  { %13 = vsyncpa [#allocation8], 0 }
   0x8   :  { %15 = vsyncpa [#allocation8 + $0x1], 0 }
   0x9   :  { %16 = vsyncpa [#allocation4], 0 }
   0xa   :  { %18 = vsyncpa [#allocation4 + $0x1], 0  ;;  %s1059_s15 = smov 0   ;;  %s1061_s16 = smov 0  }
   0xb   :  { %s1063_s17 = smov 0   ;;  %s1065_s18 = smov 0  }
   0xc   :  { %s1067_s19 = smov 0   ;;  %s1069_s20 = smov 0  }
   0xd   :  { %s1071_s21 = smov 0   ;;  %s1073_s22 = smov 0  }
   0xe   :  { %s1075_s23 = smov 0   ;;  %s1077_s24 = smov 0  }
   0xf   :  { %s1079_s25 = smov 0  }
  0x10 LB: > { %1383 = sst [smem:[#allocation15_spill]] %s1013_s23  ;;  %s33_s26 = sadd.s32 1, %s1013_s23  ;;  %s1021_s25 = sphi %s1079_s25, %s24_s25   ;;  %s1017_s24 = sphi %s1077_s24, %s1405_s24   ;;  %s1013_s23 = sphi %s1075_s23, %s1412_s23   ;;  %s1009_s22 = sphi %s1073_s22, %s1403_s22   ;;  %s1005_s21 = sphi %s1071_s21, %s1402_s21   ;;  %s1001_s20 = sphi %s1069_s20, %s1411_s20   ;;  %s997_s19 = sphi %s1067_s19, %s1410_s19   ;;  %s993_s18 = sphi %s1065_s18, %s1409_s18   ;;  %s989_s17 = sphi %s1063_s17, %s1408_s17   ;;  %s985_s16 = sphi %s1061_s16, %s1407_s16   ;;  %s981_s15 = sphi %s1059_s15, %s1406_s15  }
  0x11   : > { %1384 = sst [smem:[#allocation16_spill]] %s1017_s24  ;;  %s36_s27 = sadd.s32 1, %s1017_s24 }
  0x12   : > { %p34_p0 = scmp.ge.s32.totalorder %s33_s26, 2  ;;  %s617_s28 = sshll.u32 %s1017_s24, 1 }
  0x13   : > { %s62_s29 = sadd.s32 %s1013_s23, %s617_s28  ;;  %s68_s30 = sadd.s32 1, %s1001_s20 }
  0x14   : > { %s1414_s26 = smov (%p34_p0, %s33_s26), 0  ;;  %s1416_s27 = smov (!%p34_p0, %s36_s27), %s1017_s24 }
  0x15   : > { %1385 = sst [smem:[#allocation17_spill]] %s1414_s26  ;;  %p75_p1 = scmp.ne.s32.totalorder %s1001_s20, %s997_s19 }
  0x16   : > { %p76_p2 = scmp.eq.s32.totalorder %s1021_s25, 0  ;;  %p38_p3 = scmp.ge.s32.totalorder %s1416_s27, 2 }
  0x17   : > { %p684_p5 = scmp.lt.s32.totalorder %s1021_s25, 4  ;;  %s1129_s5 = sand.u32 1, %s1001_s20  }
  0x18   : > { %p77_p4 = por %p76_p2, %p75_p1  ;;  %s1418_s27 = smov (%p38_p3, %s1416_s27), 0 }
  0x19   : > { %1386 = sst [smem:[#allocation18_spill]] %s1418_s27  ;;  %s1131_s6 = sshll.u32 %s62_s29, 7 }
  0x1a   : > { %s618_s7 = sshll.u32 %s1418_s27, 1  ;;  %s151_s8 = ssub.s32 %s1017_s24, %s1418_s27 }
  0x1b   : > { %s64_s9 = sadd.s32 %s618_s7, %s1414_s26  ;;  %p1137_p6 = scmp.eq.s32.totalorder %s151_s8, 0 }
  0x1c   : > { %s65_s11 = ssub.s32 %s62_s29, %s64_s9  ;;  %s626_s12 = sshll.u32 %s1129_s5, 3 }
  0x1d   : > { %p66_p7 = scmp.eq.s32.totalorder %s65_s11, 0  ;;  %p1142_p8 = pnand %p684_p5, %p77_p4 }
  0x1e   : > { %s220_s14 = sand.u32 1, %s1021_s25   ;;  %s1390_s2 = sld [smem:[#allocation21_spill]] }
  0x1f   : > { %s1148_s28 = scalar_select %p66_p7, %s1001_s20, %s68_s30  }
  0x20   : > { %s224_s8 = scalar_lea.vmem [#allocation7], %s626_s12  ;;  %s632_s29 = sshll.u32 %s1129_s5, 4 }
  0x21   : > { %1389 = sst [smem:[#allocation19_spill]] %s1148_s28  ;;  %s233_s27 = sshll.u32 %s224_s8, 4  ;;  %s234_s27 = int_to_ptr.vmem [resolvable:$true] %s233_s27 }
  0x22   : > { %s1157_s9 = scalar_lea.sflag [#allocation8], %s220_s14  ;;  %p800_p9 = pneg %p1142_p8 }
  0x23   : > { %s811_s11 = scalar_lea.vmem %s234_s27, 128  ;;  %s1023_s30 = smov [#allocation7]  }
  0x24   : > { %s231_s7 = scalar_lea.hbm %s1390_s2, %s1131_s6  ;;  %p812_p10 = scmp.ne.s32.totalorder %s234_s27, %s811_s11 }
  0x25   : > { %s816_s26 = sshll.u32 %s1023_s30, 4  ;;  %s817_s26 = int_to_ptr.vmem [resolvable:$false] %s816_s26 }
  0x26   : > { %p814_p11 = pnand %p812_p10, %p800_p9  ;;  %s818_s4 = scalar_lea.vmem %s817_s26, 256 }
  0x27   : > { %p819_p13 = scmp.lt.s32.totalorder %s234_s27, %s817_s26  ;;  %p820_p0 = scmp.lt.s32.totalorder %s818_s4, %s811_s11 }
  0x28   : > { %p815_p12 = pneg %p814_p11 }
  0x29   : > { %p821_p1 = por %p820_p0, %p819_p13 }
  0x2b   : > { %p822_p2 = pnand %p821_p1, %p815_p12 }
  0x2d   : > { %825 = shalt.err (!%p822_p2)
}
  0x2e   : > { %675 = dma.hbm_to_vmem [thread:$0]  (!%p1142_p8), %s231_s7, 128, %s234_s27, %s1157_s9  }
  0x2f   : > { %s244_s8 = scalar_lea.vmem [#allocation9], %s632_s29  ;;  %s1174_s30 = sadd.s32 4294967295, %s1021_s25  }
  0x30   : > { %s252_s11 = sshll.u32 %s244_s8, 4  ;;  %s616_s4 = sadd.s32 4294967294, %s1021_s25   ;;  %s1171_s11 = int_to_ptr.vmem [resolvable:$true] %s252_s11 }
  0x31   : > { %p81_p3 = scmp.ne.s32.totalorder %s997_s19, %s993_s18  ;;  %p82_p4 = scmp.eq.s32.totalorder %s1174_s30, 0 }
  0x32   : > { %s154_s27 = sadd.s32 1, %s989_s17  ;;  %p164_p5 = scmp.ne.s32.totalorder %s989_s17, %s985_s16 }
  0x33   : > { %p1185_p7 = por %p82_p4, %p81_p3  ;;  %p165_p10 = scmp.eq.s32.totalorder %s1174_s30, 3 }
  0x34   : > { %s1193_s29 = scalar_select %p1137_p6, %s989_s17, %s154_s27  }
  0x35   : > { %p1195_p11 = por %p165_p10, %p164_p5  ;;  %p170_p12 = scmp.ne.s32.totalorder %s985_s16, %s981_s15 }
  0x36   : > { %p171_p13 = scmp.eq.s32.totalorder %s616_s4, 3  ;;  %p623_p0 = scmp.ge.s32.totalorder %s1021_s25, 1 }
  0x37   : > { %s1392_s23 = scalar_select %p1195_p11, 1, 0 }
  0x38   : > { %p178_p1 = scmp.lt.s32.totalorder %s1021_s25, 5  ;;  %p1203_p2 = por %p171_p13, %p170_p12 }
  0x39   : > { %s1395_s1 = sld [smem:[#allocation20_spill]]  ;;  %s204_s14 = scalar_lea.vmem [#allocation6], %s626_s12 }
  0x3a   : > { %s1393_s18 = scalar_select %p1203_p2, 1, 0 }
  0x3b   : > { %p1207_p3 = pnand %p623_p0, %p178_p1  ;;  %s213_s4 = sshll.u32 %s204_s14, 4  ;;  %s214_s4 = int_to_ptr.vmem [resolvable:$true] %s213_s4 }
  0x3c   : > { %s201_s24 = scalar_lea.sflag [#allocation3], %s1129_s5  ;;  %s839_s28 = scalar_lea.vmem %s214_s4, 128 }
  0x3d   : > { %p665_p6 = pneg %p1207_p3  ;;  %p840_p10 = scmp.ne.s32.totalorder %s214_s4, %s839_s28 }
  0x3e   : > { %s1024_s10 = smov [#allocation6]  }
  0x3f   : > { %s211_s27 = scalar_lea.hbm %s1395_s1, %s1131_s6  ;;  %p1221_p5 = pnand %p665_p6, %p82_p4 }
  0x40   : > { %p842_p12 = pnand %p840_p10, %p800_p9  ;;  %s844_s8 = sshll.u32 %s1024_s10, 4  ;;  %s845_s8 = int_to_ptr.vmem [resolvable:$false] %s844_s8 }
  0x41   : > { %s846_s1 = scalar_lea.vmem %s845_s8, 256  ;;  %p847_p0 = scmp.lt.s32.totalorder %s214_s4, %s845_s8 }
  0x42   : > { %p843_p13 = pneg %p842_p12  ;;  %p848_p1 = scmp.lt.s32.totalorder %s846_s1, %s839_s28 }
  0x44   : > { %p849_p2 = por %p848_p1, %p847_p0 }
  0x46   : > { %p850_p11 = pnand %p849_p2, %p843_p13 }
  0x48   : > { %853 = shalt.err (!%p850_p11)
}
  0x49   : > { %672 = dma.hbm_to_vmem [thread:$0]  (!%p1142_p8), %s211_s27, 128, %s214_s4, %s201_s24  }
  0x4a   : > { %s1025_s5 = smov [#allocation2]   ;;  %s878_s10 = scalar_lea.vmem %s1171_s11, 256 }
  0x4b   : > { %668 = dma.hbm_to_smem (!%p1221_p5), %s1369_s0, 16, %s1025_s5, [#allocation5]  }
  0x4c   : > { %p879_p6 = scmp.ne.s32.totalorder %s1171_s11, %s878_s10  ;;  %s1026_s1 = smov [#allocation9]  }
  0x4d   : > { %s883_s28 = sshll.u32 %s1026_s1, 4  ;;  %s884_s28 = int_to_ptr.vmem [resolvable:$false] %s883_s28 }
  0x4e   : > { %p881_p2 = pnand %p879_p6, %p800_p9  ;;  %s885_s8 = scalar_lea.vmem %s884_s28, 512 }
  0x4f   : > { %p886_p10 = scmp.lt.s32.totalorder %s1171_s11, %s884_s28  ;;  %p887_p12 = scmp.lt.s32.totalorder %s885_s8, %s878_s10 }
  0x50   : > { %p882_p11 = pneg %p881_p2 }
  0x51   : > { %p888_p13 = por %p887_p12, %p886_p10 }
  0x53   : > { %p889_p0 = pnand %p888_p13, %p882_p11 }
  0x55   : > { %892 = shalt.err (!%p889_p0)
}
  0x56   : > { %s1027_s2 = smov 512   ;;  %s1028_s24 = smov 128  }
  0x57   : > { %s1029_s27 = smov 8   ;;  %s1397_s12 = scalar_lea.hbm %s1372_s3, %s1131_s6 }
  0x58   : > { %678 = dma.hbm_to_vmem [thread:$0]  (!%p1142_p8), %s1397_s12, 256, %s1171_s11, %s1157_s9, %s1027_s2, %s1028_s24, %s1029_s27  }
  0x59   : > { %264 = sbr.rel (%p1207_p3) target bundleno = 200 (0xc8), region = 36 }
  0x5e   : > { %964 = dma.done.wait (%p82_p4), [#allocation5], 16  }
  0x5f   : > { %966 = vsyncadd (%p82_p4), [#allocation5], 4294967280  ;;  %s270_s14 = sand.u32 1, %s997_s19  }
  0x60   : > { %s637_s10 = sshll.u32 %s270_s14, 3  ;;  %s271_s1 = scalar_lea.sflag [#allocation3], %s270_s14 }
  0x61   : > { %s274_s13 = scalar_lea.vmem [#allocation6], %s637_s10 }
  0x62   : > { %968 = dma.done.wait (%p1185_p7), %s271_s1, 128  }
  0x63   : > { %970 = vsyncadd (%p1185_p7), %s271_s1, 4294967168  ;;  %s279_s6 = sand.u32 1, %s1174_s30   ;;  %s283_s11 = scalar_lea.vmem [#allocation7], %s637_s10 }
  0x64   : > { %s280_s9 = scalar_lea.sflag [#allocation8], %s279_s6 }
  0x65   : > { %972 = dma.done.wait (%p1185_p7), %s280_s9, 384  }
  0x66   : > { %974 = vsyncadd (%p1185_p7), %s280_s9, 4294966912  ;;  %s639_s26 = sshll.u32 %s270_s14, 4 }
  0x67   : > { %s1267_s28 = scalar_lea.vmem [#allocation9], %s639_s26 }
  0x68   : > { %297 = sfence }
  0x69   : > { %s325_s8 = sand.u32 1, %s985_s16   ;;  %p640_p8 = scmp.ne.s32.totalorder %s1005_s21, 0 }
  0x6a   : > { %s651_s2 = smul.u32 56, %s325_s8 }
  0x6b   : > { %337 = sbr.rel (%p640_p8) target bundleno = 117 (0x75), region = 56 }
  0x6c   : > { %s1272_s24 = scalar_lea.vmem [#allocation10], %s651_s2 }
  0x70   : > { %v1030_v0 = vmov 0.0  }
  0x71   : > { %338 = vst [vmem:[%s1272_s24] sm:$0xff] %v1030_v0  ;;  %339 = vst [vmem:[%s1272_s24 + $0x8] sm:$0xff] %v1030_v0 }
  0x72   : > { %340 = vst [vmem:[%s1272_s24 + $0x10] sm:$0xff] %v1030_v0  ;;  %341 = vst [vmem:[%s1272_s24 + $0x18] sm:$0xff] %v1030_v0 }
  0x73   : > { %342 = vst [vmem:[%s1272_s24 + $0x20] sm:$0xff] %v1030_v0  ;;  %343 = vst [vmem:[%s1272_s24 + $0x28] sm:$0xff] %v1030_v0 }
  0x74   : > { %344 = vst [vmem:[%s1272_s24 + $0x30] sm:$0xff] %v1030_v0 }
  0x75 PF: > { %v345_v1 = vld [vmem:[%s274_s13] sm:$0xff]  ;;  %v346_v2 = vld [vmem:[%s283_s11] sm:$0xff]  ;;  %s353_s21 = sld [smem:[#allocation2]]  ;;  %s652_s14 = smul.u32 896, %s1009_s22 }
  0x76   : > { %v350_v3 = vsub.f32 %v345_v1, %v346_v2  ;;  %s642_s30 = sld [smem:[#allocation2 + $0x1]]  ;;  %v347_v15 = vld [vmem:[%s1267_s28] sm:$0xff]  ;;  %v641_v26 = vld [vmem:[%s1267_s28 + $0x8] sm:$0xff]  ;;  %s470_s10 = sshll.u32 %s1272_s24, 4  ;;  %s1303_s10 = int_to_ptr.vmem [resolvable:$true] %s470_s10 }
  0x77   : > { %s645_s7 = sld [smem:[#allocation2 + $0x2]]  ;;  %v385_v21 = vadd.f32 1.1920929e-07, %v347_v15  ;;  %v420_v31 = vadd.f32 1.1920929e-07, %v641_v26  ;;  %s1309_s22 = scalar_lea.sflag [#allocation4], %s325_s8 }
  0x78   : > { %v435_v4 = vld [vmem:[%s1272_s24] sm:$0xff]  ;;  %v351_v5 = vand.u32 2147483647, %v350_v3  ;;  %s643_s5 = sld [smem:[#allocation2 + $0x3]]  ;;  %v436_v62 = vld [vmem:[%s1272_s24 + $0x8] sm:$0xff]  ;;  %s893_s11 = scalar_lea.vmem %s1303_s10, 896 }
  0x79   : > { %s646_s12 = sld [smem:[#allocation2 + $0x4]]  ;;  %p894_p9 = scmp.ne.s32.totalorder %s1303_s10, %s893_s11 }
  0x7a   : > { %v442_v6 = vadd.f32 %v435_v4, %v351_v5  ;;  %v438_v4 = vld [vmem:[%s1272_s24 + $0x18] sm:$0xff]  ;;  %v437_v5 = vld [vmem:[%s1272_s24 + $0x10] sm:$0xff]  ;;  %s1398_s6 = sld [smem:[#allocation22_spill]]  ;;  %p1399_p4 = scmp.ne.s32.totalorder %s1392_s23, 0 }
  0x7b   : > { %v354_v7 = vstv %s353_s21  ;;  %s1031_s26 = smov [#allocation10]  }
  0x7c   : > { %v355_v8 = vadd.f32 %v354_v7, %v346_v2  ;;  %v360_v9 = vadd.f32 %v354_v7, %v345_v1  ;;  %449 = vst [vmem:[%s1272_s24] sm:$0xff] %v442_v6  ;;  %s367_s27 = ssub.f32 0.0, %s642_s30  ;;  %p895_p7 = pnand %p894_p9, %p1399_p4 }
  0x7d   : > { %s400_s4 = ssub.f32 0.0, %s645_s7  ;;  %s897_s28 = sshll.u32 %s1031_s26, 4  ;;  %s898_s28 = int_to_ptr.vmem [resolvable:$false] %s897_s28 }
  0x7e   : > { %782 = vrcp.f32 %v355_v8  ;;  %v368_v17 = vstv %s367_s27  ;;  %v375_v32 = vstv %s643_s5  ;;  %p896_p3 = pneg %p895_p7  ;;  %s899_s2 = scalar_lea.vmem %s898_s28, 1792 }
  0x7f   : > { %784 = vrcp.f32 %v360_v9  ;;  %v401_v18 = vstv %s400_s4  ;;  %v377_v35 = vsub.f32 %v375_v32, %v347_v15  ;;  %v408_v36 = vstv %s646_s12  ;;  %p900_p5 = scmp.lt.s32.totalorder %s1303_s10, %s898_s28  ;;  %p901_p1 = scmp.lt.s32.totalorder %s899_s2, %s893_s11 }
  0x80   : > { %786 = vrcp.f32 %v385_v21  ;;  %v410_v41 = vsub.f32 %v408_v36, %v641_v26  ;;  %s1301_s9 = scalar_lea.hbm %s1398_s6, %s652_s14 }
  0x81   : > { %p902_p6 = por %p901_p1, %p900_p5 }
  0x83   : > { %p903_p2 = pnand %p902_p6, %p896_p3 }
  0x8b   : > { %v783_v10 = vpop.eup %782 }
  0x8c   : > { %v785_v11 = vpop.eup %784  ;;  %v357_v12 = vmul.f32 %v783_v10, %v355_v8 }
  0x8d   : > { %v362_v13 = vmul.f32 %v785_v11, %v360_v9  ;;  %v787_v33 = vpop.eup %786 }
  0x8e   : > { %v358_v14 = vsub.f32 2.0, %v357_v12 }
  0x8f   : > { %v363_v16 = vsub.f32 2.0, %v362_v13 }
  0x90   : > { %v359_v19 = vmul.f32 %v783_v10, %v358_v14 }
  0x91   : > { %v364_v20 = vmul.f32 %v785_v11, %v363_v16  ;;  %v439_v11 = vld [vmem:[%s1272_s24 + $0x20] sm:$0xff] }
  0x92   : > { %v369_v22 = vmul.f32 %v368_v17, %v359_v19  ;;  %v402_v23 = vmul.f32 %v401_v18, %v359_v19  ;;  %v440_v19 = vld [vmem:[%s1272_s24 + $0x28] sm:$0xff] }
  0x93   : > { %v372_v24 = vmul.f32 %v368_v17, %v364_v20  ;;  %v405_v25 = vmul.f32 %v401_v18, %v364_v20 }
  0x94   : > { %v370_v27 = vmul.f32 1.442695, %v369_v22  ;;  %v403_v28 = vmul.f32 1.442695, %v402_v23  ;;  %v441_v22 = vld [vmem:[%s1272_s24 + $0x30] sm:$0xff] }
  0x95   : > { %v373_v29 = vmul.f32 1.442695, %v372_v24  ;;  %v406_v30 = vmul.f32 1.442695, %v405_v25 }
  0x96   : > { %788 = vpow2.f32 %v370_v27 }
  0x97   : > { %790 = vpow2.f32 %v373_v29 }
  0x98   : > { %792 = vpow2.f32 %v403_v28 }
  0x99   : > { %794 = vpow2.f32 %v406_v30 }
  0x9a   : > { %796 = vrcp.f32 %v420_v31 }
  0xa3   : > { %v789_v34 = vpop.eup %788 }
  0xa4   : > { %v791_v37 = vpop.eup %790  ;;  %v383_v38 = vmul.f32 %v789_v34, %v375_v32 }
  0xa5   : > { %v793_v39 = vpop.eup %792  ;;  %v376_v40 = vmul.f32 %v791_v37, %v375_v32  ;;  %v379_v42 = vsub.f32 0.0, %v791_v37 }
  0xa6   : > { %v795_v43 = vpop.eup %794  ;;  %v384_v44 = vsub.f32 %v375_v32, %v383_v38  ;;  %v418_v45 = vmul.f32 %v793_v39, %v408_v36 }
  0xa7   : > { %v797_v46 = vpop.eup %796  ;;  %v378_v47 = vsub.f32 %v377_v35, %v376_v40  ;;  %v409_v48 = vmul.f32 %v795_v43, %v408_v36  ;;  %v412_v49 = vsub.f32 0.0, %v795_v43  ;;  %v392_v51 = vsub.f32 %v376_v40, %v789_v34 }
  0xa8   : > { %v387_v50 = vmul.f32 %v787_v33, %v384_v44  ;;  %v419_v52 = vsub.f32 %v408_v36, %v418_v45 }
  0xa9   : > { %v381_v53 = vmax.f32 %v378_v47, 0.0  ;;  %v411_v54 = vsub.f32 %v410_v41, %v409_v48  ;;  %v380_v55 = vsub.f32 %v379_v42, %v378_v47  ;;  %v427_v58 = vsub.f32 %v409_v48, %v793_v39 }
  0xaa   : > { %v644_v56 = vadd.f32 -0.6, %v387_v50  ;;  %v422_v57 = vmul.f32 %v797_v46, %v419_v52  ;;  %v393_v0 = vadd.f32 %v392_v51, %v347_v15 }
  0xab   : > { %v414_v59 = vmax.f32 %v411_v54, 0.0  ;;  %v382_v60 = vmax.f32 %v380_v55, 0.0  ;;  %v413_v61 = vsub.f32 %v412_v49, %v411_v54  ;;  %v428_v8 = vadd.f32 %v641_v26, %v427_v58 }
  0xac   : > { %v389_v63 = vmax.f32 %v644_v56, 0.0  ;;  %v647_v1 = vadd.f32 -0.6, %v422_v57 }
  0xad   : > { %v416_v2 = vadd.f32 %v414_v59, %v381_v53  ;;  %v415_v3 = vmax.f32 %v413_v61, 0.0 }
  0xae   : > { %v390_v6 = vmin.f32 %v389_v63, 1.0  ;;  %v424_v7 = vmax.f32 %v647_v1, 0.0 }
  0xaf   : > { %v443_v9 = vadd.f32 %v436_v62, %v416_v2  ;;  %v417_v10 = vadd.f32 %v415_v3, %v382_v60 }
  0xb0   : > { %v394_v12 = vmul.f32 %v393_v0, %v390_v6  ;;  %v445_v13 = vadd.f32 %v438_v4, %v390_v6  ;;  %v425_v14 = vmin.f32 %v424_v7, 1.0 }
  0xb1   : > { %450 = vst [vmem:[%s1272_s24 + $0x8] sm:$0xff] %v443_v9  ;;  %v444_v15 = vadd.f32 %v437_v5, %v417_v10 }
  0xb2   : > { %452 = vst [vmem:[%s1272_s24 + $0x18] sm:$0xff] %v445_v13  ;;  %v429_v16 = vmul.f32 %v428_v8, %v425_v14  ;;  %v446_v17 = vadd.f32 %v439_v11, %v425_v14  ;;  %v395_v18 = vsub.f32 %v394_v12, %v375_v32 }
  0xb3   : > { %451 = vst [vmem:[%s1272_s24 + $0x10] sm:$0xff] %v444_v15 }
  0xb4   : > { %453 = vst [vmem:[%s1272_s24 + $0x20] sm:$0xff] %v446_v17  ;;  %v396_v20 = vmax.f32 %v395_v18, 0.0  ;;  %v430_v21 = vsub.f32 %v429_v16, %v408_v36 }
  0xb6   : > { %v447_v23 = vadd.f32 %v440_v19, %v396_v20  ;;  %v431_v24 = vmax.f32 %v430_v21, 0.0 }
  0xb8   : > { %454 = vst [vmem:[%s1272_s24 + $0x28] sm:$0xff] %v447_v23  ;;  %v448_v25 = vadd.f32 %v441_v22, %v431_v24 }
  0xba   : > { %455 = vst [vmem:[%s1272_s24 + $0x30] sm:$0xff] %v448_v25 }
  0xbb   : > { %906 = shalt.err (!%p903_p2)
}
  0xbc   : > { %s907_s8 = scalar_lea.hbm %s1301_s9, 896  ;;  %s911_s30 = scalar_lea.hbm %s1398_s6, 1792 }
  0xbd   : > { %p908_p11 = scmp.ne.s32.totalorder %s1301_s9, %s907_s8  ;;  %p912_p13 = scmp.lt.s32.totalorder %s1301_s9, %s1398_s6 }
  0xbe   : > { %p913_p0 = scmp.lt.s32.totalorder %s911_s30, %s907_s8 }
  0xbf   : > { %p909_p10 = pnand %p908_p11, %p1399_p4 }
  0xc0   : > { %p914_p8 = por %p913_p0, %p912_p13 }
  0xc1   : > { %p910_p12 = pneg %p909_p10 }
  0xc3   : > { %p915_p9 = pnand %p914_p8, %p910_p12 }
  0xc5   : > { %918 = shalt.err (!%p915_p9)
}
  0xc6   : > { %s1032_s4 = smov 128   ;;  %s1033_s5 = smov 8  }
  0xc7   : > { %663 = dma.vmem_to_hbm [thread:$0]  (%p1399_p4), %s1303_s10, 896, %s1301_s9, %s1309_s22, %s1032_s4, %s1032_s4, %s1033_s5  }
  0xc8 PF: > { %p686_p7 = scmp.ge.s32.totalorder %s1021_s25, 2  ;;  %s485_s12 = sand.u32 1, %s981_s15  }
  0xc9   : > { %p1400_p3 = scmp.ne.s32.totalorder %s1393_s18, 0  ;;  %s486_s14 = scalar_lea.sflag [#allocation4], %s485_s12 }
  0xcb   : > { %p680_p5 = pnand %p686_p7, %p1400_p3 }
  0xcd   : > { %p681_p1 = pneg %p680_p5 }
  0xcf   : > { %976 = dma.done.wait (%p681_p1), %s486_s14, 896  }
  0xd0   : > { %978 = vsyncadd (%p681_p1), %s486_s14, 4294966400  ;;  %s24_s25 = sadd.s32 1, %s1021_s25   ;;  %s1401_s23 = sld [smem:[#allocation19_spill]] }
  0xd1   : > { %p21_p6 = scmp.ge.s32.totalorder %s24_s25, 6   ;;  %s1402_s21 = sld [smem:[#allocation15_spill]] }
  0xd2   : > { %s1403_s22 = sld [smem:[#allocation16_spill]]  ;;  %s1406_s15 = smov %s985_s16 }
  0xd3   : > { %s1404_s10 = sld [smem:[#allocation17_spill]]  ;;  %s1407_s16 = smov %s989_s17 }
  0xd4   : > { %s1405_s24 = sld [smem:[#allocation18_spill]]  ;;  %s1408_s17 = smov %s1193_s29 }
  0xd5   : > { %s1409_s18 = smov %s997_s19  ;;  %s1410_s19 = smov %s1001_s20 }
  0xd6   : > { %s1411_s20 = smov %s1401_s23  ;;  %23 = sbr.rel (!%p21_p6) target bundleno = 16 (0x10), region = 115 }
  0xd9   : > { %s1412_s23 = smov %s1404_s10 }
  0xdb   :  { %491 = vsyncpa [#allocation3], 1 }
  0xdc   :  { %493 = vsyncpa [#allocation3 + $0x1], 1 }
  0xdd   :  { %494 = vsyncpa [#allocation8], 1 }
  0xde   :  { %496 = vsyncpa [#allocation8 + $0x1], 1 }
  0xdf   :  { %497 = vsyncpa [#allocation4], 1 }
  0xe0   :  { %499 = vsyncpa [#allocation4 + $0x1], 1 }
  0xe1   :  { %500 = vsyncpa [#allocation5], 1 }
  0xe2   :  { %502 = vsyncpa [#allocation5 + $0x1], 1 }

</bundles_post_ra>
